<compile_context>
chip_gen: v5e
topology: v5e:2x2
jax: 0.10.0
libtpu: 0.0.40
codegen_flags: <defaults>
</compile_context>

<pallas_src>
import functools

import jax
import jax.numpy as jnp
from jax.experimental import pallas as pl
from jax.experimental.pallas import tpu as pltpu


def dsfe_fused_kernel(x_ref, w_ref, gamma_ref, beta_ref, g_ref, t_ref, o_ref,
                      u_slab, ssum_ref, sq_ref, pilot_ref, ss_ref, *,
                      rows_per_group, tile_f, last_rows, fold, eps, neg_slope,
                      use_slab):
    p = pl.program_id(0)          # 0 = stats pass, 1 = apply pass
    i = pl.program_id(1)          # row-tile index
    nt = pl.num_programs(1)

    # ---------------- pass 0: u = x@W, batch statistics ----------------
    @pl.when(p == 0)
    def _stats_pass():
        u = jnp.dot(x_ref[...], w_ref[...], preferred_element_type=jnp.float32)

        if use_slab:  # keep u resident in VMEM so pass 1 never touches x again
            off = pl.multiple_of(i * tile_f, tile_f)
            u_slab[pl.ds(off, tile_f), :] = u

        @pl.when(i == 0)
        def _init():
            # pilot = per-(folded)-column mean of the first tile; shifts the
            # accumulation to avoid E[u^2]-E[u]^2 cancellation.
            pilot_ref[...] = jnp.mean(u, axis=0, keepdims=True)
            ssum_ref[...] = jnp.zeros_like(ssum_ref)
            sq_ref[...] = jnp.zeros_like(sq_ref)

        d = u - pilot_ref[...]

        def _accum(dv):
            ssum_ref[...] += jnp.sum(dv, axis=0, keepdims=True)
            sq_ref[...] += jnp.sum(dv * dv, axis=0, keepdims=True)

        if last_rows == tile_f:           # no padded rows anywhere (static)
            _accum(d)
        else:                             # mask only on the (single) partial last tile
            @pl.when(i < nt - 1)
            def _full():
                _accum(d)

            @pl.when(i == nt - 1)
            def _partial():
                row = jax.lax.broadcasted_iota(jnp.int32, (tile_f, 1), 0)
                _accum(jnp.where(row < last_rows, d, 0.0))

        @pl.when(i == nt - 1)
        def _finalize():
            inv_n = 1.0 / float(rows_per_group)      # rows seen per lane group
            mean_c = pilot_ref[...] + ssum_ref[...] * inv_n          # (1, C)
            em = ssum_ref[...] * inv_n
            var_c = sq_ref[...] * inv_n - em * em                    # (1, C), shifted -> stable
            inv_f = 1.0 / float(fold)
            # Combine the F lane groups exactly (parallel-variance formula).
            m = jnp.dot(mean_c, g_ref[...],
                        preferred_element_type=jnp.float32) * inv_f  # (1, out_f)
            m_t = jnp.dot(m, t_ref[...],
                          preferred_element_type=jnp.float32)        # (1, C)
            dm = mean_c - m_t
            v = jnp.dot(var_c + dm * dm, g_ref[...],
                        preferred_element_type=jnp.float32) * inv_f  # (1, out_f)
            scale = gamma_ref[...] * jax.lax.rsqrt(v + eps)          # rsqrt -> EUP slot
            shift = beta_ref[...] - m * scale
            # Store the folded (lane-tiled) affine directly with slice stores.
            ss_ref[0:1, :] = jnp.dot(scale, t_ref[...], preferred_element_type=jnp.float32)
            ss_ref[1:2, :] = jnp.dot(shift, t_ref[...], preferred_element_type=jnp.float32)

    # ---------------- pass 1: folded affine + LeakyReLU ----------------
    @pl.when(p == 1)
    def _apply_pass():
        if use_slab:
            off = pl.multiple_of(i * tile_f, tile_f)
            u = u_slab[pl.ds(off, tile_f), :]
        else:  # slab too large for VMEM: recompute (memory-bound, recompute is cheap)
            u = jnp.dot(x_ref[...], w_ref[...], preferred_element_type=jnp.float32)
        z = u * ss_ref[0:1, :] + ss_ref[1:2, :]
        o_ref[...] = jnp.where(z >= 0, z, neg_slope * z).astype(o_ref.dtype)


def dsfe_forward(x, w, b, gamma, beta, *, tile_rows=8192, eps=1e-5,
                 neg_slope=0.01, max_slab_bytes=None):
    # `b` (Linear bias) is unused: training-mode BatchNorm cancels it exactly.
    del b
    n, in_f = x.shape
    out_f = w.shape[1]

    # ---- lane-folding factor: pack F original rows into one folded row ----
    if n % 4 == 0:
        fold = 4
    elif n % 2 == 0:
        fold = 2
    else:
        fold = 1
    nf = n // fold                    # folded rows
    kf = in_f * fold                  # folded contraction dim (256 for F=4)
    cf = out_f * fold                 # folded output lanes (128 for F=4)

    xf = x.reshape(nf, kf)            # contiguous row-major reshape: free
    w_bd = jnp.kron(jnp.eye(fold, dtype=jnp.float32),
                    w.astype(jnp.float32))                 # (kf, cf) block-diagonal
    gamma2 = gamma.reshape(1, out_f).astype(jnp.float32)
    beta2 = beta.reshape(1, out_f).astype(jnp.float32)
    eye = jnp.eye(out_f, dtype=jnp.float32)
    g_mat = jnp.tile(eye, (fold, 1))  # (cf, out_f): sums the F lane groups
    t_mat = jnp.tile(eye, (1, fold))  # (out_f, cf): tiles a per-feature vector

    # ---- row tiling (in folded rows): multiple of 8, full extent when it fits ----
    tile_f = max(8, (max(tile_rows, 8 * fold) // fold) // 8 * 8)
    if nf <= tile_f:
        tile_f = nf                   # single full-extent block (always layout-legal)
    num_tiles = pl.cdiv(nf, tile_f)
    last_rows = nf - (num_tiles - 1) * tile_f

    # ---- VMEM budgeting: keep the u slab only if it (plus working set) fits ----
    try:
        vmem_cap = int(getattr(pltpu.get_tpu_info(), "vmem_capacity_bytes", 64 << 20))
    except Exception:
        vmem_cap = 64 << 20           # v7x-safe assumption
    slab_bytes = num_tiles * tile_f * cf * 4
    slab_budget = (vmem_cap // 2) if max_slab_bytes is None else max_slab_bytes
    use_slab = slab_bytes <= slab_budget

    x_tile_bytes = tile_f * kf * 4
    o_tile_bytes = tile_f * cf * 4
    resident = kf * cf * 4 + 2 * cf * out_f * 4 + 8 * cf * 4 + 4 * out_f * 4
    needed = (2 * x_tile_bytes + 2 * o_tile_bytes + resident
              + (slab_bytes if use_slab else 8 * cf * 4) + (1 << 20))
    vmem_limit = max(needed, 32 << 20)
    vmem_limit = min(vmem_limit, max(vmem_cap - (8 << 20), 32 << 20))

    nt = num_tiles
    if use_slab:
        # Pass 1 does not need x: pin its block index to the last pass-0 block so
        # no x DMA is issued at all during pass 1.
        x_index = lambda p, i: (i * (1 - p) + (nt - 1) * p, 0)
        slab_rows = nt * tile_f
    else:
        x_index = lambda p, i: (i, 0)
        slab_rows = 8                 # dummy (unused)

    kern = functools.partial(
        dsfe_fused_kernel,
        rows_per_group=nf, tile_f=tile_f, last_rows=last_rows, fold=fold,
        eps=eps, neg_slope=neg_slope, use_slab=use_slab)

    out_folded = pl.pallas_call(
        kern,
        out_shape=jax.ShapeDtypeStruct((nf, cf), jnp.float32),
        grid_spec=pltpu.PrefetchScalarGridSpec(
            num_scalar_prefetch=0,
            grid=(2, num_tiles),                                 # (pass, row tile)
            in_specs=[
                pl.BlockSpec((tile_f, kf), x_index),             # x row tile
                pl.BlockSpec((kf, cf), lambda p, i: (0, 0)),     # block-diag W, resident
                pl.BlockSpec((1, out_f), lambda p, i: (0, 0)),   # gamma, resident
                pl.BlockSpec((1, out_f), lambda p, i: (0, 0)),   # beta, resident
                pl.BlockSpec((cf, out_f), lambda p, i: (0, 0)),  # fold matrix G, resident
                pl.BlockSpec((out_f, cf), lambda p, i: (0, 0)),  # tile matrix T, resident
            ],
            # During pass 0 the output block index is pinned to 0 -> no garbage
            # writebacks; pass 1 streams blocks 0..nt-1 with lane-dense stores.
            out_specs=pl.BlockSpec((tile_f, cf), lambda p, i: (p * i, 0)),
            scratch_shapes=[
                pltpu.VMEM((slab_rows, cf), jnp.float32),  # u slab (pass 0 -> pass 1)
                pltpu.VMEM((1, cf), jnp.float32),          # shifted sum
                pltpu.VMEM((1, cf), jnp.float32),          # shifted sum of squares
                pltpu.VMEM((1, cf), jnp.float32),          # pilot (stability shift)
                pltpu.VMEM((2, cf), jnp.float32),          # folded (scale, shift)
            ],
        ),
        compiler_params=pltpu.CompilerParams(
            dimension_semantics=("arbitrary", "arbitrary"),
            vmem_limit_bytes=int(vmem_limit)),
    )(xf, w_bd, gamma2, beta2, g_mat, t_mat)

    return out_folded.reshape(n, out_f)


def dsfe_reference(x, w, b, gamma, beta, eps=1e-5, neg_slope=0.01):
    y = x @ w + b
    mean = y.mean(axis=0, keepdims=True)
    var = ((y - mean) ** 2).mean(axis=0, keepdims=True)
    z = (y - mean) / jnp.sqrt(var + eps) * gamma.reshape(1, -1) + beta.reshape(1, -1)
    return jnp.where(z >= 0, z, neg_slope * z)


if __name__ == "__main__":
    key = jax.random.PRNGKey(0)
    k_x, k_w, k_b, k_g, k_bt, k_x2, k_x3, k_x4 = jax.random.split(key, 8)

    IN, OUT = 64, 32
    bound = 1.0 / jnp.sqrt(jnp.float32(IN))
    w = jax.random.uniform(k_w, (IN, OUT), jnp.float32, -bound, bound)
    b = jax.random.uniform(k_b, (1, OUT), jnp.float32, -bound, bound)
    gamma = 1.0 + 0.1 * jax.random.normal(k_g, (1, OUT), jnp.float32)
    beta = 0.1 * jax.random.normal(k_bt, (1, OUT), jnp.float32)

    # Small shape consistent with the module: batch=8, in_features=64 (fold=4).
    x = jax.random.normal(k_x, (8, IN), jnp.float32)
    out = dsfe_forward(x, w, b, gamma, beta)
    jax.block_until_ready(out)
    ref = dsfe_reference(x, w, b, gamma, beta)
    assert out.shape == (8, OUT)
    assert jnp.allclose(out, ref, atol=1e-4, rtol=1e-4), "mismatch (batch=8)"

    # Multi-tile + padded last tile + VMEM u-slab path (fold=4).
    x2 = jax.random.normal(k_x2, (300, IN), jnp.float32)
    ref2 = dsfe_reference(x2, w, b, gamma, beta)
    out2 = dsfe_forward(x2, w, b, gamma, beta, tile_rows=128)
    jax.block_until_ready(out2)
    assert jnp.allclose(out2, ref2, atol=1e-4, rtol=1e-4), "mismatch (tiled+slab)"

    # Same shape, force the no-slab fallback (pass 1 recomputes u = x@W).
    out2b = dsfe_forward(x2, w, b, gamma, beta, tile_rows=128, max_slab_bytes=0)
    jax.block_until_ready(out2b)
    assert jnp.allclose(out2b, ref2, atol=1e-4, rtol=1e-4), "mismatch (no-slab fallback)"

    # Odd batch sizes exercise the fold=2 and fold=1 layouts.
    x3 = jax.random.normal(k_x3, (10, IN), jnp.float32)
    out3 = dsfe_forward(x3, w, b, gamma, beta)
    jax.block_until_ready(out3)
    assert jnp.allclose(out3, dsfe_reference(x3, w, b, gamma, beta),
                        atol=1e-4, rtol=1e-4), "mismatch (fold=2)"

    x4 = jax.random.normal(k_x4, (9, IN), jnp.float32)
    out4 = dsfe_forward(x4, w, b, gamma, beta)
    jax.block_until_ready(out4)
    assert jnp.allclose(out4, dsfe_reference(x4, w, b, gamma, beta),
                        atol=1e-4, rtol=1e-4), "mismatch (fold=1)"

    print("KERNEL_OK")
</pallas_src>

<mosaic_0001>
module attributes {stable_mosaic.version = 11 : i64} {
  func.func @dsfe_fused_kernel(%arg0: i32, %arg1: i32, %arg2: memref<2x256xf32, #tpu.memory_space<vmem>>, %arg3: memref<256x128xf32, #tpu.memory_space<vmem>>, %arg4: memref<1x32xf32, #tpu.memory_space<vmem>>, %arg5: memref<1x32xf32, #tpu.memory_space<vmem>>, %arg6: memref<128x32xf32, #tpu.memory_space<vmem>>, %arg7: memref<32x128xf32, #tpu.memory_space<vmem>>, %arg8: memref<2x128xf32, #tpu.memory_space<vmem>>, %arg9: memref<2x128xf32, #tpu.memory_space<vmem>>, %arg10: memref<1x128xf32, #tpu.memory_space<vmem>>, %arg11: memref<1x128xf32, #tpu.memory_space<vmem>>, %arg12: memref<1x128xf32, #tpu.memory_space<vmem>>, %arg13: memref<2x128xf32, #tpu.memory_space<vmem>>) attributes {dimension_semantics = [#tpu.dimension_semantics<arbitrary>, #tpu.dimension_semantics<arbitrary>], iteration_bounds = array<i64: 2, 1>, scalar_prefetch = 0 : i64, scratch_operands = 5 : i64, tpu.core_type = #tpu.core_type<tc>, window_params = [{transform_indices = @transform_0, window_bounds = array<i64: 2, 256>}, {pipeline_mode = #tpu.pipeline_mode<synchronous>, transform_indices = @transform_1, window_bounds = array<i64: 256, 128>}, {pipeline_mode = #tpu.pipeline_mode<synchronous>, transform_indices = @transform_2, window_bounds = array<i64: 1, 32>}, {pipeline_mode = #tpu.pipeline_mode<synchronous>, transform_indices = @transform_3, window_bounds = array<i64: 1, 32>}, {pipeline_mode = #tpu.pipeline_mode<synchronous>, transform_indices = @transform_4, window_bounds = array<i64: 128, 32>}, {pipeline_mode = #tpu.pipeline_mode<synchronous>, transform_indices = @transform_5, window_bounds = array<i64: 32, 128>}, {transform_indices = @transform_6, window_bounds = array<i64: 2, 128>}]} {
    %c0_i32 = arith.constant 0 : i32
    %0 = arith.cmpi eq, %arg0, %c0_i32 : i32
    %1 = arith.extui %0 : i1 to i32
    %c0_i32_0 = arith.constant 0 : i32
    %2 = arith.cmpi ne, %1, %c0_i32_0 : i32
    scf.if %2 {
      %c0 = arith.constant 0 : index
      %c0_2 = arith.constant 0 : index
      %6 = vector.load %arg2[%c0, %c0_2] : memref<2x256xf32, #tpu.memory_space<vmem>>, vector<2x256xf32>
      %c0_3 = arith.constant 0 : index
      %c0_4 = arith.constant 0 : index
      %7 = vector.load %arg3[%c0_3, %c0_4] : memref<256x128xf32, #tpu.memory_space<vmem>>, vector<256x128xf32>
      %cst = arith.constant dense<0.000000e+00> : vector<2x128xf32>
      %8 = tpu.matmul %6, %7, %cst {dimension_numbers = #tpu.dot_dimension_numbers<[1], [0], [0], [1], [0, 0, 1, 1], [], []>} : vector<2x256xf32>, vector<256x128xf32>, vector<2x128xf32> -> vector<2x128xf32>
      %c2_i32 = arith.constant 2 : i32
      %9 = arith.muli %arg1, %c2_i32 : i32
      %10 = tpu.assume_multiple %9, 2 : i32
      %11 = arith.index_cast %10 : i32 to index
      %c0_5 = arith.constant 0 : index
      %12 = vector.load %arg9[%11, %c0_5] : memref<2x128xf32, #tpu.memory_space<vmem>>, vector<2x128xf32>
      tpu.vector_store %arg9[%11, %c0_5], %8 {strides = array<i32>} : memref<2x128xf32, #tpu.memory_space<vmem>>, vector<2x128xf32>,
      %c0_i32_6 = arith.constant 0 : i32
      %13 = arith.cmpi eq, %arg1, %c0_i32_6 : i32
      %14 = arith.extui %13 : i1 to i32
      %c0_i32_7 = arith.constant 0 : i32
      %15 = arith.cmpi ne, %14, %c0_i32_7 : i32
      scf.if %15 {
        %cst_22 = arith.constant dense<0.000000e+00> : vector<128xf32>
        %33 = vector.multi_reduction <add>, %8, %cst_22 [0] : vector<2x128xf32> to vector<128xf32>
        %34 = vector.shape_cast %33 : vector<128xf32> to vector<1x128xf32>
        %cst_23 = arith.constant 2.000000e+00 : f32
        %35 = vector.broadcast %cst_23 : f32 to vector<1x128xf32>
        %36 = arith.divf %34, %35 : vector<1x128xf32>
        %c0_24 = arith.constant 0 : index
        %c0_25 = arith.constant 0 : index
        %37 = vector.load %arg12[%c0_24, %c0_25] : memref<1x128xf32, #tpu.memory_space<vmem>>, vector<1x128xf32>
        tpu.vector_store %arg12[%c0_24, %c0_25], %36 {strides = array<i32>} : memref<1x128xf32, #tpu.memory_space<vmem>>, vector<1x128xf32>,
        %cst_26 = arith.constant 0.000000e+00 : f32
        %38 = vector.broadcast %cst_26 : f32 to vector<1x128xf32>
        %c0_27 = arith.constant 0 : index
        %c0_28 = arith.constant 0 : index
        %39 = vector.load %arg10[%c0_27, %c0_28] : memref<1x128xf32, #tpu.memory_space<vmem>>, vector<1x128xf32>
        tpu.vector_store %arg10[%c0_27, %c0_28], %38 {strides = array<i32>} : memref<1x128xf32, #tpu.memory_space<vmem>>, vector<1x128xf32>,
        %cst_29 = arith.constant 0.000000e+00 : f32
        %40 = vector.broadcast %cst_29 : f32 to vector<1x128xf32>
        %c0_30 = arith.constant 0 : index
        %c0_31 = arith.constant 0 : index
        %41 = vector.load %arg11[%c0_30, %c0_31] : memref<1x128xf32, #tpu.memory_space<vmem>>, vector<1x128xf32>
        tpu.vector_store %arg11[%c0_30, %c0_31], %40 {strides = array<i32>} : memref<1x128xf32, #tpu.memory_space<vmem>>, vector<1x128xf32>,
      } else {
      }
      %c0_8 = arith.constant 0 : index
      %c0_9 = arith.constant 0 : index
      %16 = vector.load %arg12[%c0_8, %c0_9] : memref<1x128xf32, #tpu.memory_space<vmem>>, vector<1x128xf32>
      %17 = vector.broadcast %16 : vector<1x128xf32> to vector<2x128xf32>
      %18 = arith.subf %8, %17 : vector<2x128xf32>
      %c0_10 = arith.constant 0 : index
      %c0_11 = arith.constant 0 : index
      %19 = vector.load %arg10[%c0_10, %c0_11] : memref<1x128xf32, #tpu.memory_space<vmem>>, vector<1x128xf32>
      %cst_12 = arith.constant dense<0.000000e+00> : vector<128xf32>
      %20 = vector.multi_reduction <add>, %18, %cst_12 [0] : vector<2x128xf32> to vector<128xf32>
      %21 = vector.shape_cast %20 : vector<128xf32> to vector<1x128xf32>
      %22 = arith.addf %19, %21 : vector<1x128xf32>
      %c0_13 = arith.constant 0 : index
      %c0_14 = arith.constant 0 : index
      %23 = vector.load %arg10[%c0_13, %c0_14] : memref<1x128xf32, #tpu.memory_space<vmem>>, vector<1x128xf32>
      tpu.vector_store %arg10[%c0_13, %c0_14], %22 {strides = array<i32>} : memref<1x128xf32, #tpu.memory_space<vmem>>, vector<1x128xf32>,
      %c0_15 = arith.constant 0 : index
      %c0_16 = arith.constant 0 : index
      %24 = vector.load %arg11[%c0_15, %c0_16] : memref<1x128xf32, #tpu.memory_space<vmem>>, vector<1x128xf32>
      %25 = arith.mulf %18, %18 : vector<2x128xf32>
      %cst_17 = arith.constant dense<0.000000e+00> : vector<128xf32>
      %26 = vector.multi_reduction <add>, %25, %cst_17 [0] : vector<2x128xf32> to vector<128xf32>
      %27 = vector.shape_cast %26 : vector<128xf32> to vector<1x128xf32>
      %28 = arith.addf %24, %27 : vector<1x128xf32>
      %c0_18 = arith.constant 0 : index
      %c0_19 = arith.constant 0 : index
      %29 = vector.load %arg11[%c0_18, %c0_19] : memref<1x128xf32, #tpu.memory_space<vmem>>, vector<1x128xf32>
      tpu.vector_store %arg11[%c0_18, %c0_19], %28 {strides = array<i32>} : memref<1x128xf32, #tpu.memory_space<vmem>>, vector<1x128xf32>,
      %c0_i32_20 = arith.constant 0 : i32
      %30 = arith.cmpi eq, %arg1, %c0_i32_20 : i32
      %31 = arith.extui %30 : i1 to i32
      %c0_i32_21 = arith.constant 0 : i32
      %32 = arith.cmpi ne, %31, %c0_i32_21 : i32
      scf.if %32 {
        %c0_22 = arith.constant 0 : index
        %c0_23 = arith.constant 0 : index
        %33 = vector.load %arg12[%c0_22, %c0_23] : memref<1x128xf32, #tpu.memory_space<vmem>>, vector<1x128xf32>
        %c0_24 = arith.constant 0 : index
        %c0_25 = arith.constant 0 : index
        %34 = vector.load %arg10[%c0_24, %c0_25] : memref<1x128xf32, #tpu.memory_space<vmem>>, vector<1x128xf32>
        %cst_26 = arith.constant 5.000000e-01 : f32
        %35 = vector.broadcast %cst_26 : f32 to vector<1x128xf32>
        %36 = arith.mulf %34, %35 : vector<1x128xf32>
        %37 = arith.addf %33, %36 : vector<1x128xf32>
        %c0_27 = arith.constant 0 : index
        %c0_28 = arith.constant 0 : index
        %38 = vector.load %arg10[%c0_27, %c0_28] : memref<1x128xf32, #tpu.memory_space<vmem>>, vector<1x128xf32>
        %cst_29 = arith.constant 5.000000e-01 : f32
        %39 = vector.broadcast %cst_29 : f32 to vector<1x128xf32>
        %40 = arith.mulf %38, %39 : vector<1x128xf32>
        %c0_30 = arith.constant 0 : index
        %c0_31 = arith.constant 0 : index
        %41 = vector.load %arg11[%c0_30, %c0_31] : memref<1x128xf32, #tpu.memory_space<vmem>>, vector<1x128xf32>
        %cst_32 = arith.constant 5.000000e-01 : f32
        %42 = vector.broadcast %cst_32 : f32 to vector<1x128xf32>
        %43 = arith.mulf %41, %42 : vector<1x128xf32>
        %44 = arith.mulf %40, %40 : vector<1x128xf32>
        %45 = arith.subf %43, %44 : vector<1x128xf32>
        %c0_33 = arith.constant 0 : index
        %c0_34 = arith.constant 0 : index
        %46 = vector.load %arg6[%c0_33, %c0_34] : memref<128x32xf32, #tpu.memory_space<vmem>>, vector<128x32xf32>
        %cst_35 = arith.constant dense<0.000000e+00> : vector<1x32xf32>
        %47 = tpu.matmul %37, %46, %cst_35 {dimension_numbers = #tpu.dot_dimension_numbers<[1], [0], [0], [1], [0, 0, 1, 1], [], []>} : vector<1x128xf32>, vector<128x32xf32>, vector<1x32xf32> -> vector<1x32xf32>
        %cst_36 = arith.constant 2.500000e-01 : f32
        %48 = vector.broadcast %cst_36 : f32 to vector<1x32xf32>
        %49 = arith.mulf %47, %48 : vector<1x32xf32>
        %c0_37 = arith.constant 0 : index
        %c0_38 = arith.constant 0 : index
        %50 = vector.load %arg7[%c0_37, %c0_38] : memref<32x128xf32, #tpu.memory_space<vmem>>, vector<32x128xf32>
        %cst_39 = arith.constant dense<0.000000e+00> : vector<1x128xf32>
        %51 = tpu.matmul %49, %50, %cst_39 {dimension_numbers = #tpu.dot_dimension_numbers<[1], [0], [0], [1], [0, 0, 1, 1], [], []>} : vector<1x32xf32>, vector<32x128xf32>, vector<1x128xf32> -> vector<1x128xf32>
        %52 = arith.subf %37, %51 : vector<1x128xf32>
        %53 = arith.mulf %52, %52 : vector<1x128xf32>
        %54 = arith.addf %45, %53 : vector<1x128xf32>
        %c0_40 = arith.constant 0 : index
        %c0_41 = arith.constant 0 : index
        %55 = vector.load %arg6[%c0_40, %c0_41] : memref<128x32xf32, #tpu.memory_space<vmem>>, vector<128x32xf32>
        %cst_42 = arith.constant dense<0.000000e+00> : vector<1x32xf32>
        %56 = tpu.matmul %54, %55, %cst_42 {dimension_numbers = #tpu.dot_dimension_numbers<[1], [0], [0], [1], [0, 0, 1, 1], [], []>} : vector<1x128xf32>, vector<128x32xf32>, vector<1x32xf32> -> vector<1x32xf32>
        %cst_43 = arith.constant 2.500000e-01 : f32
        %57 = vector.broadcast %cst_43 : f32 to vector<1x32xf32>
        %58 = arith.mulf %56, %57 : vector<1x32xf32>
        %c0_44 = arith.constant 0 : index
        %c0_45 = arith.constant 0 : index
        %59 = vector.load %arg4[%c0_44, %c0_45] : memref<1x32xf32, #tpu.memory_space<vmem>>, vector<1x32xf32>
        %cst_46 = arith.constant 9.99999974E-6 : f32
        %60 = vector.broadcast %cst_46 : f32 to vector<1x32xf32>
        %61 = arith.addf %58, %60 : vector<1x32xf32>
        %62 = math.rsqrt %61 : vector<1x32xf32>
        %63 = arith.mulf %59, %62 : vector<1x32xf32>
        %c0_47 = arith.constant 0 : index
        %c0_48 = arith.constant 0 : index
        %64 = vector.load %arg5[%c0_47, %c0_48] : memref<1x32xf32, #tpu.memory_space<vmem>>, vector<1x32xf32>
        %65 = arith.mulf %49, %63 : vector<1x32xf32>
        %66 = arith.subf %64, %65 : vector<1x32xf32>
        %c0_49 = arith.constant 0 : index
        %c0_50 = arith.constant 0 : index
        %67 = vector.load %arg7[%c0_49, %c0_50] : memref<32x128xf32, #tpu.memory_space<vmem>>, vector<32x128xf32>
        %cst_51 = arith.constant dense<0.000000e+00> : vector<1x128xf32>
        %68 = tpu.matmul %63, %67, %cst_51 {dimension_numbers = #tpu.dot_dimension_numbers<[1], [0], [0], [1], [0, 0, 1, 1], [], []>} : vector<1x32xf32>, vector<32x128xf32>, vector<1x128xf32> -> vector<1x128xf32>
        %c0_52 = arith.constant 0 : index
        %c0_53 = arith.constant 0 : index
        %69 = vector.load %arg13[%c0_52, %c0_53] : memref<2x128xf32, #tpu.memory_space<vmem>>, vector<1x128xf32>
        tpu.vector_store %arg13[%c0_52, %c0_53], %68 {strides = array<i32>} : memref<2x128xf32, #tpu.memory_space<vmem>>, vector<1x128xf32>,
        %c0_54 = arith.constant 0 : index
        %c0_55 = arith.constant 0 : index
        %70 = vector.load %arg7[%c0_54, %c0_55] : memref<32x128xf32, #tpu.memory_space<vmem>>, vector<32x128xf32>
        %cst_56 = arith.constant dense<0.000000e+00> : vector<1x128xf32>
        %71 = tpu.matmul %66, %70, %cst_56 {dimension_numbers = #tpu.dot_dimension_numbers<[1], [0], [0], [1], [0, 0, 1, 1], [], []>} : vector<1x32xf32>, vector<32x128xf32>, vector<1x128xf32> -> vector<1x128xf32>
        %c1 = arith.constant 1 : index
        %c0_57 = arith.constant 0 : index
        %72 = vector.load %arg13[%c1, %c0_57] : memref<2x128xf32, #tpu.memory_space<vmem>>, vector<1x128xf32>
        tpu.vector_store %arg13[%c1, %c0_57], %71 {strides = array<i32>} : memref<2x128xf32, #tpu.memory_space<vmem>>, vector<1x128xf32>,
      } else {
      }
    } else {
    }
    %c1_i32 = arith.constant 1 : i32
    %3 = arith.cmpi eq, %arg0, %c1_i32 : i32
    %4 = arith.extui %3 : i1 to i32
    %c0_i32_1 = arith.constant 0 : i32
    %5 = arith.cmpi ne, %4, %c0_i32_1 : i32
    scf.if %5 {
      %c2_i32 = arith.constant 2 : i32
      %6 = arith.muli %arg1, %c2_i32 : i32
      %7 = tpu.assume_multiple %6, 2 : i32
      %8 = arith.index_cast %7 : i32 to index
      %c0 = arith.constant 0 : index
      %9 = vector.load %arg9[%8, %c0] : memref<2x128xf32, #tpu.memory_space<vmem>>, vector<2x128xf32>
      %c0_2 = arith.constant 0 : index
      %c0_3 = arith.constant 0 : index
      %10 = vector.load %arg13[%c0_2, %c0_3] : memref<2x128xf32, #tpu.memory_space<vmem>>, vector<1x128xf32>
      %11 = vector.broadcast %10 : vector<1x128xf32> to vector<2x128xf32>
      %12 = arith.mulf %9, %11 : vector<2x128xf32>
      %c1 = arith.constant 1 : index
      %c0_4 = arith.constant 0 : index
      %13 = vector.load %arg13[%c1, %c0_4] : memref<2x128xf32, #tpu.memory_space<vmem>>, vector<1x128xf32>
      %14 = vector.broadcast %13 : vector<1x128xf32> to vector<2x128xf32>
      %15 = arith.addf %12, %14 : vector<2x128xf32>
      %cst = arith.constant 0.000000e+00 : f32
      %16 = vector.broadcast %cst : f32 to vector<2x128xf32>
      %17 = arith.cmpf oge, %15, %16 : vector<2x128xf32>
      %cst_5 = arith.constant 0.00999999977 : f32
      %18 = vector.broadcast %cst_5 : f32 to vector<2x128xf32>
      %19 = arith.mulf %18, %15 : vector<2x128xf32>
      %20 = arith.select %17, %15, %19 : vector<2x128xi1>, vector<2x128xf32>
      %c0_6 = arith.constant 0 : index
      %c0_7 = arith.constant 0 : index
      %21 = vector.load %arg8[%c0_6, %c0_7] : memref<2x128xf32, #tpu.memory_space<vmem>>, vector<2x128xf32>
      tpu.vector_store %arg8[%c0_6, %c0_7], %20 {strides = array<i32>} : memref<2x128xf32, #tpu.memory_space<vmem>>, vector<2x128xf32>,
    } else {
    }
    return
  }
  func.func @transform_0(%arg0: i32, %arg1: i32) -> (i32, i32) {
    %c1_i32 = arith.constant 1 : i32
    %0 = arith.subi %c1_i32, %arg0 : i32
    %1 = arith.muli %arg1, %0 : i32
    %c0_i32 = arith.constant 0 : i32
    %2 = arith.muli %c0_i32, %arg0 : i32
    %3 = arith.addi %1, %2 : i32
    %c0_i32_0 = arith.constant 0 : i32
    %c0_i32_1 = arith.constant 0 : i32
    return %3, %c0_i32_0 : i32, i32
  }
  func.func @transform_1(%arg0: i32, %arg1: i32) -> (i32, i32) {
    %c0_i32 = arith.constant 0 : i32
    %c0_i32_0 = arith.constant 0 : i32
    %c0_i32_1 = arith.constant 0 : i32
    return %c0_i32, %c0_i32_0 : i32, i32
  }
  func.func @transform_2(%arg0: i32, %arg1: i32) -> (i32, i32) {
    %c0_i32 = arith.constant 0 : i32
    %c0_i32_0 = arith.constant 0 : i32
    %c0_i32_1 = arith.constant 0 : i32
    return %c0_i32, %c0_i32_0 : i32, i32
  }
  func.func @transform_3(%arg0: i32, %arg1: i32) -> (i32, i32) {
    %c0_i32 = arith.constant 0 : i32
    %c0_i32_0 = arith.constant 0 : i32
    %c0_i32_1 = arith.constant 0 : i32
    return %c0_i32, %c0_i32_0 : i32, i32
  }
  func.func @transform_4(%arg0: i32, %arg1: i32) -> (i32, i32) {
    %c0_i32 = arith.constant 0 : i32
    %c0_i32_0 = arith.constant 0 : i32
    %c0_i32_1 = arith.constant 0 : i32
    return %c0_i32, %c0_i32_0 : i32, i32
  }
  func.func @transform_5(%arg0: i32, %arg1: i32) -> (i32, i32) {
    %c0_i32 = arith.constant 0 : i32
    %c0_i32_0 = arith.constant 0 : i32
    %c0_i32_1 = arith.constant 0 : i32
    return %c0_i32, %c0_i32_0 : i32, i32
  }
  func.func @transform_6(%arg0: i32, %arg1: i32) -> (i32, i32) {
    %0 = arith.muli %arg0, %arg1 : i32
    %c0_i32 = arith.constant 0 : i32
    %c0_i32_0 = arith.constant 0 : i32
    return %0, %c0_i32 : i32, i32
  }
}

</mosaic_0001>

<bundles_post_ra>
// kernel: tpu_custom_call.1
= control target key start
LH: loop header
LB: loop body
LE: loop exit
PB: predicated region body
PF: predicated region fallthrough
CT: control target
= control target key end

     0   :  { %11 = vsyncpa [#allocation8], 0  ;;  %s1114_s0 = inlined_call_operand.vmem [shape: f32[2,256], index: 0, kind: input, shape index: {}]   ;;  %s1115_s1 = inlined_call_operand.hbm [shape: f32[256,128], index: 1, kind: input, shape index: {}]   ;;  %s1116_s2 = inlined_call_operand.vmem [shape: f32[1,32], index: 2, kind: input, shape index: {}]   ;;  %s1117_s3 = inlined_call_operand.vmem [shape: f32[1,32], index: 3, kind: input, shape index: {}]   ;;  %s1118_s4 = inlined_call_operand.vmem [shape: f32[128,32], index: 4, kind: input, shape index: {}]   ;;  %s1119_s5 = inlined_call_operand.vmem [shape: f32[32,128], index: 5, kind: input, shape index: {}]   ;;  %s1120_s6 = inlined_call_operand.hbm [shape: f32[2,128], index: 6, kind: output, shape index: {}]  }
   0x1   :  { %12 = vsyncpa [#allocation9], 0 }
   0x2   :  { %14 = vsyncpa [#allocation9 + $0x1], 0  ;;  %s923_s21 = smov 0   ;;  %s925_s22 = smov 0  }
   0x3   :  { %s927_s23 = smov 0  }
   0x4 LB: > { %s717_s24 = sadd.s32 4294967295, %s880_s23   ;;  %s718_s25 = sadd.s32 4294967294, %s880_s23   ;;  %s880_s23 = sphi %s927_s23, %s20_s23   ;;  %s876_s22 = sphi %s925_s22, %s1123_s22   ;;  %s872_s21 = sphi %s923_s21, %s1122_s21  }
   0x5   : > { %s32_s26 = sadd.s32 1, %s876_s22  ;;  %p719_p0 = scmp.ge.s32.totalorder %s880_s23, 1 }
   0x6   : > { %p34_p1 = scmp.ge.s32.totalorder %s32_s26, 2  ;;  %p200_p2 = scmp.lt.s32.totalorder %s880_s23, 3 }
   0x7   : > { %p945_p3 = scmp.eq.s32.totalorder %s717_s24, 0  ;;  %s211_s30 = sshll.u32 %s1115_s1, 4  ;;  %s212_s30 = int_to_ptr.hbm [resolvable:$true] %s211_s30 }
   0x8   : > { %s1125_s26 = smov (%p34_p1, %s32_s26), 0  ;;  %p201_p4 = pnand %p719_p0, %p200_p2 }
   0x9   : > { %s882_s7 = smov [#allocation7]   ;;  %s883_s9 = smov 128  }
   0xa   : > { %p742_p5 = pneg %p201_p4  ;;  %s213_s8 = sshll.u32 %s882_s7, 4  ;;  %s214_s8 = int_to_ptr.vmem [resolvable:$true] %s213_s8 }
   0xb   : > { %s884_s10 = smov 8   ;;  %253 = sbr.rel (%p201_p4) target bundleno = 816 (0x330), region = 44 }
   0xc   : > { %p743_p6 = pnand %p945_p3, %p742_p5 }
   0xe   : > { %745 = dma.hbm_to_vmem [thread:$0]  (!%p743_p6), %s212_s30, 4096, %s214_s8, [#allocation8], %s883_s9, %s883_s9, %s884_s10  }
  0x10   : > { %863 = dma.done.wait (%p945_p3), [#allocation8], 4096  }
  0x11   : > { %865 = vsyncadd (%p945_p3), [#allocation8], 4294963200  ;;  %p725_p7 = scmp.ne.s32.totalorder %s872_s21, 0 }
  0x13   : > { %299 = sbr.rel (%p725_p7) target bundleno = 796 (0x31c), region = 52 }
  0x18   : > { %v316_v0 = vld [vmem:[#allocation7 + $0x78] sm:$0xff]  ;;  %v315_v2 = vld [vmem:[#allocation7 + $0x70] sm:$0xff]  ;;  %v314_v4 = vld [vmem:[#allocation7 + $0x68] sm:$0xff]  ;;  %v885_v35 = vmov 0.0   ;;  %v886_v36 = vmov 2.0   ;;  %vm386_vm0 = vcmask 1041408  }
  0x19   : > { %v332_v1 = vld [vmem:[#allocation7 + $0xf8] sm:$0xff]  ;;  %339 = vmatpush.msra.mxu0 %v316_v0  ;;  %v331_v3 = vld [vmem:[#allocation7 + $0xf0] sm:$0xff]  ;;  %v330_v5 = vld [vmem:[#allocation7 + $0xe8] sm:$0xff]  ;;  %403 = vst [vmem:[#allocation3] sm:$0x1] %v885_v35  ;;  %786 = vrcp.f32 %v886_v36  ;;  %vm484_vm2 = vcmask 261120  }
  0x1a   : > { %359 = vmatpush.msra.mxu1 %v332_v1  ;;  %v313_v6 = vld [vmem:[#allocation7 + $0x60] sm:$0xff]  ;;  %v312_v8 = vld [vmem:[#allocation7 + $0x58] sm:$0xff]  ;;  %v311_v10 = vld [vmem:[#allocation7 + $0x50] sm:$0xff]  ;;  %404 = vst [vmem:[#allocation4] sm:$0x1] %v885_v35 }
  0x1b   : > { %340 = vmatpush.msra.mxu0 %v315_v2  ;;  %v329_v7 = vld [vmem:[#allocation7 + $0xe0] sm:$0xff]  ;;  %v328_v9 = vld [vmem:[#allocation7 + $0xd8] sm:$0xff]  ;;  %v327_v11 = vld [vmem:[#allocation7 + $0xd0] sm:$0xff] }
  0x1c   : > { %360 = vmatpush.msra.mxu1 %v331_v3  ;;  %v310_v12 = vld [vmem:[#allocation7 + $0x48] sm:$0xff]  ;;  %v300_v14 = vld [vmem:[%s1114_s0] sm:$0xf]  ;;  %v309_v15 = vld [vmem:[#allocation7 + $0x40] sm:$0xff] }
  0x1d   : > { %341 = vmatpush.msra.mxu0 %v314_v4  ;;  %v326_v13 = vld [vmem:[#allocation7 + $0xc8] sm:$0xff]  ;;  %334 = vst [vmem:[#allocation1] ss:$4 sm:$0xff] %v300_v14  ;;  %v325_v16 = vld [vmem:[#allocation7 + $0xc0] sm:$0xff]  ;;  %v308_v17 = vld [vmem:[#allocation7 + $0x38] sm:$0xff] }
  0x1e   : > { %361 = vmatpush.msra.mxu1 %v330_v5  ;;  %v324_v18 = vld [vmem:[#allocation7 + $0xb8] sm:$0xff]  ;;  %v307_v19 = vld [vmem:[#allocation7 + $0x30] sm:$0xff]  ;;  %v306_v21 = vld [vmem:[#allocation7 + $0x28] sm:$0xff] }
  0x1f   : > { %342 = vmatpush.msra.mxu0 %v313_v6  ;;  %v323_v20 = vld [vmem:[#allocation7 + $0xb0] sm:$0xff]  ;;  %v322_v22 = vld [vmem:[#allocation7 + $0xa8] sm:$0xff]  ;;  %v305_v23 = vld [vmem:[#allocation7 + $0x20] sm:$0xff]  ;;  %v787_v38 = vpop.eup %786 }
  0x20   : > { %362 = vmatpush.msra.mxu1 %v329_v7  ;;  %v321_v24 = vld [vmem:[#allocation7 + $0xa0] sm:$0xff]  ;;  %v304_v25 = vld [vmem:[#allocation7 + $0x18] sm:$0xff]  ;;  %v303_v27 = vld [vmem:[#allocation7 + $0x10] sm:$0xff]  ;;  %v395_v41 = vmul.f32 2.0, %v787_v38  ;;  %vm399_vm1 = vweird.f32 %v787_v38 }
  0x21   : > { %343 = vmatpush.msra.mxu0 %v312_v8  ;;  %v320_v26 = vld [vmem:[#allocation7 + $0x98] sm:$0xff]  ;;  %v319_v28 = vld [vmem:[#allocation7 + $0x90] sm:$0xff]  ;;  %v302_v29 = vld [vmem:[#allocation7 + $0x8] sm:$0xff] }
  0x22   : > { %363 = vmatpush.msra.mxu1 %v328_v9  ;;  %v318_v30 = vld [vmem:[#allocation7 + $0x88] sm:$0xff]  ;;  %v301_v31 = vld [vmem:[#allocation7] sm:$0xff]  ;;  %v985_v42 = vld [vmem:[%s1118_s4 + $0x60] sm:$0xff]  ;;  %v396_v47 = vsub.f32 1.0, %v395_v41 }
  0x23   : > { %344 = vmatpush.msra.mxu0 %v311_v10  ;;  %v317_v32 = vld [vmem:[#allocation7 + $0x80] sm:$0xff]  ;;  %v967_v37 = vld [vmem:[%s1118_s4 + $0x78] sm:$0xff]  ;;  %v1010_v54 = vld [vmem:[%s1118_s4 + $0x40] sm:$0xff] }
  0x24   : > { %364 = vmatpush.msra.mxu1 %v327_v11  ;;  %v335_v33 = vld.sshfl [vmem:[#allocation1] sm:$0xff pattern:$0x73625140]  ;;  %v336_v34 = vld.sshfl [vmem:[#allocation1 + $0x8] sm:$0xff pattern:$0x73625140]  ;;  %459 = vmatpush.msra.mxu2 %v967_v37  ;;  %v397_v52 = vmul.f32 %v787_v38, %v396_v47 }
  0x25   : > { %345 = vmatpush.msra.mxu0 %v310_v12  ;;  %v973_v39 = vld [vmem:[%s1118_s4 + $0x70] sm:$0xff]  ;;  %v979_v40 = vld [vmem:[%s1118_s4 + $0x68] sm:$0xff]  ;;  %v991_v45 = vld [vmem:[%s1118_s4 + $0x58] sm:$0xff] }
  0x26   : > { %365 = vmatpush.msra.mxu1 %v326_v13  ;;  %460 = vmatpush.msra.mxu2 %v973_v39  ;;  %v997_v48 = vld [vmem:[%s1118_s4 + $0x50] sm:$0xff]  ;;  %v1004_v51 = vld [vmem:[%s1118_s4 + $0x48] sm:$0xff]  ;;  %v1016_v56 = vld [vmem:[%s1118_s4 + $0x38] sm:$0xff]  ;;  %v398_v57 = vadd.f32 %v787_v38, %v397_v52 }
  0x27   : > { %346 = vmatpush.msra.mxu0 %v309_v15  ;;  %v1022_v59 = vld [vmem:[%s1118_s4 + $0x30] sm:$0xff]  ;;  %v1028_v61 = vld [vmem:[%s1118_s4 + $0x28] sm:$0xff]  ;;  %v1034_v0 = vld [vmem:[%s1118_s4 + $0x20] sm:$0xff] }
  0x28   : > { %366 = vmatpush.msra.mxu1 %v325_v16  ;;  %461 = vmatpush.msra.mxu2 %v979_v40  ;;  %v400_v62 = vsel %vm399_vm1, %v787_v38, %v398_v57  ;;  %v1039_v1 = vld [vmem:[%s1118_s4 + $0x18] sm:$0xff]  ;;  %v1045_v3 = vld [vmem:[%s1118_s4 + $0x10] sm:$0xff]  ;;  %v444_v4 = vld [vmem:[%s1118_s4 + $0x8] sm:$0xff] }
  0x29   : > { %347 = vmatpush.msra.mxu0 %v308_v17  ;;  %v1055_v5 = vld [vmem:[%s1118_s4] sm:$0xff]  ;;  %v483_v6 = vld [vmem:[%s1119_s5 + $0x18] sm:$0xff]  ;;  %v482_v7 = vld [vmem:[%s1119_s5 + $0x10] sm:$0xff] }
  0x2a   : > { %367 = vmatpush.msra.mxu1 %v324_v18  ;;  %462 = vmatpush.msra.mxu2 %v985_v42  ;;  %v545_v57 = vld [vmem:[%s1117_s3] sm:$0x1] }
  0x2b   : > { %348 = vmatpush.msra.mxu0 %v307_v19  ;;  %500 = vmatpush.msra.mxu3 %v483_v6 }
  0x2c   : > { %368 = vmatpush.msra.mxu1 %v323_v20  ;;  %463 = vmatpush.msra.mxu2 %v991_v45 }
  0x2d   : > { %349 = vmatpush.msra.mxu0 %v306_v21  ;;  %501 = vmatpush.msra.mxu3 %v482_v7 }
  0x2e   : > { %369 = vmatpush.msra.mxu1 %v322_v22  ;;  %464 = vmatpush.msra.mxu2 %v997_v48  ;;  %v410_v22 = vld [vmem:[#allocation3] sm:$0x1] }
  0x2f   : > { %350 = vmatpush.msra.mxu0 %v305_v23 }
  0x30   : > { %370 = vmatpush.msra.mxu1 %v321_v24  ;;  %465 = vmatpush.msra.mxu2 %v1004_v51 }
  0x31   : > { %351 = vmatpush.msra.mxu0 %v304_v25  ;;  %v421_v25 = vld [vmem:[#allocation4] sm:$0x1] }
  0x32   : > { %371 = vmatpush.msra.mxu1 %v320_v26  ;;  %466 = vmatpush.msra.mxu2 %v1010_v54 }
  0x33   : > { %352 = vmatpush.msra.mxu0 %v303_v27 }
  0x34   : > { %372 = vmatpush.msra.mxu1 %v319_v28  ;;  %467 = vmatpush.msra.mxu2 %v1016_v56 }
  0x35   : > { %353 = vmatpush.msra.mxu0 %v302_v29 }
  0x36   : > { %373 = vmatpush.msra.mxu1 %v318_v30  ;;  %468 = vmatpush.msra.mxu2 %v1022_v59 }
  0x37   : > { %354 = vmatpush.msra.mxu0 %v301_v31 }
  0x38   : > { %374 = vmatpush.msra.mxu1 %v317_v32  ;;  %355 = vmatmul.f32.vlgmr.msra.gmra.mxu0 %v335_v33  ;;  %v481_v33 = vld [vmem:[%s1119_s5 + $0x8] sm:$0xff] }
  0x39   : > { %375 = vmatmul.f32.vlgmr.msra.gmra.mxu1 %v336_v34  ;;  %469 = vmatpush.msra.mxu2 %v1028_v61  ;;  %v480_v34 = vld [vmem:[%s1119_s5] sm:$0xff] }
  0x3a   : > { %563 = vmatpush.msrb.mxu0 %v483_v6  ;;  %591 = vmatpush.msrb.mxu1 %v483_v6 }
  0x3b   : > { %470 = vmatpush.msra.mxu2 %v1034_v0  ;;  %502 = vmatpush.msra.mxu3 %v481_v33 }
  0x3c   : > { %564 = vmatpush.msrb.mxu0 %v482_v7  ;;  %592 = vmatpush.msrb.mxu1 %v482_v7 }
  0x3d   : > { %471 = vmatpush.msra.mxu2 %v1039_v1  ;;  %503 = vmatpush.msra.mxu3 %v480_v34 }
  0x3e   : > { %565 = vmatpush.msrb.mxu0 %v481_v33  ;;  %593 = vmatpush.msrb.mxu1 %v481_v33 }
  0x3f   : > { %472 = vmatpush.msra.mxu2 %v1045_v3  ;;  %511 = vmatpush.msrb.mxu3 %v967_v37 }
  0x40   : > { %566 = vmatpush.msrb.mxu0 %v480_v34  ;;  %594 = vmatpush.msrb.mxu1 %v480_v34 }
  0x41   : > { %473 = vmatpush.msra.mxu2 %v444_v4  ;;  %512 = vmatpush.msrb.mxu3 %v973_v39 }
  0x43   : > { %474 = vmatpush.msra.mxu2 %v1055_v5  ;;  %513 = vmatpush.msrb.mxu3 %v979_v40 }
  0x45   : > { %514 = vmatpush.msrb.mxu3 %v985_v42 }
  0x47   : > { %515 = vmatpush.msrb.mxu3 %v991_v45 }
  0x49   : > { %516 = vmatpush.msrb.mxu3 %v997_v48 }
  0x4b   : > { %517 = vmatpush.msrb.mxu3 %v1004_v51 }
  0x4d   : > { %518 = vmatpush.msrb.mxu3 %v1010_v54  ;;  %v532_v54 = vld [vmem:[%s1116_s2] sm:$0x1] }
  0x4f   : > { %519 = vmatpush.msrb.mxu3 %v1016_v56 }
  0x51   : > { %520 = vmatpush.msrb.mxu3 %v1022_v59 }
  0x53   : > { %521 = vmatpush.msrb.mxu3 %v1028_v61 }
  0x55   : > { %522 = vmatpush.msrb.mxu3 %v1034_v0 }
  0x57   : > { %523 = vmatpush.msrb.mxu3 %v1039_v1 }
  0x59   : > { %524 = vmatpush.msrb.mxu3 %v1045_v3 }
  0x5b   : > { %525 = vmatpush.msrb.mxu3 %v444_v4 }
  0x5d   : > { %526 = vmatpush.msrb.mxu3 %v1055_v5 }
  0xb5   : > { %v356_v43 = vpop.f32.mrf.mxu0 }
  0xb6   : > { %v376_v44 = vpop.f32.mrf.mxu1 }
  0xb7   : > { %v377_v46 = vadd.f32 %v376_v44, %v356_v43 }
  0xb9   : > { %381 = vst [vmem:[#allocation2] sm:$0x3] %v377_v46  ;;  %v387_v49 = vsel %vm386_vm0, %v377_v46, 0.0 }
  0xba   : > { %v388_v50 = vrot.slane %v387_v49, 4 }
  0xbc   : > { %v389_v53 = vadd.f32 %v388_v50, %v387_v49 }
  0xbe   : > { %v390_v55 = vrot.slane %v389_v53, 2 }
  0xc0   : > { %v391_v58 = vadd.f32 %v390_v55, %v389_v53 }
  0xc2   : > { %v392_v60 = vrot.slane %v391_v58, 1 }
  0xc4   : > { %v393_v63 = vadd.f32 %v392_v60, %v391_v58 }
  0xc6   : > { %v401_v2 = vmul.f32 %v400_v62, %v393_v63 }
  0xc8   : > { %402 = vst [vmem:[#allocation5] sm:$0x1] %v401_v2 }
  0xcf   : > { %v785_v8 = vld [vmem:[#allocation5] ss:$0 sm:$0xff] }
  0xd0   : > { %v409_v9 = vsub.f32 %v377_v46, %v785_v8  ;;  %v435_v31 = vld [vmem:[#allocation5] sm:$0x1] }
  0xd2   : > { %v412_v10 = vsel %vm386_vm0, %v409_v9, 0.0  ;;  %v422_v11 = vmul.f32 %v409_v9, %v409_v9 }
  0xd3   : > { %v413_v12 = vrot.slane %v412_v10, 4 }
  0xd4   : > { %v423_v13 = vsel %vm386_vm0, %v422_v11, 0.0 }
  0xd5   : > { %v414_v14 = vadd.f32 %v413_v12, %v412_v10  ;;  %v424_v15 = vrot.slane %v423_v13, 4 }
  0xd7   : > { %v415_v16 = vrot.slane %v414_v14, 2  ;;  %v425_v17 = vadd.f32 %v424_v15, %v423_v13 }
  0xd9   : > { %v416_v18 = vadd.f32 %v415_v16, %v414_v14  ;;  %v426_v19 = vrot.slane %v425_v17, 2 }
  0xdb   : > { %v417_v20 = vrot.slane %v416_v18, 1  ;;  %v427_v21 = vadd.f32 %v426_v19, %v425_v17 }
  0xdd   : > { %v418_v23 = vadd.f32 %v417_v20, %v416_v18  ;;  %v428_v24 = vrot.slane %v427_v21, 1 }
  0xdf   : > { %v419_v26 = vadd.f32 %v418_v23, %v410_v22  ;;  %v429_v27 = vadd.f32 %v428_v24, %v427_v21 }
  0xe1   : > { %420 = vst [vmem:[#allocation3] sm:$0x1] %v419_v26  ;;  %v430_v28 = vadd.f32 %v429_v27, %v421_v25 }
  0xe3   : > { %431 = vst [vmem:[#allocation4] sm:$0x1] %v430_v28 }
  0xe8   : > { %v436_v29 = vld [vmem:[#allocation3] sm:$0x1] }
  0xe9   : > { %v437_v30 = vmul.f32 0.5, %v436_v29 }
  0xea   : > { %v439_v37 = vld [vmem:[#allocation4] sm:$0x1] }
  0xeb   : > { %v438_v32 = vadd.f32 %v437_v30, %v435_v31  ;;  %v441_v38 = vmul.f32 %v437_v30, %v437_v30  ;;  %v440_v39 = vmul.f32 0.5, %v439_v37 }
  0xed   : > { %475 = vmatmul.f32.vlgmr.msra.gmra.mxu2 %v438_v32  ;;  %v442_v42 = vsub.f32 %v440_v39, %v441_v38 }
 0x170   : > { %v476_v35 = vpop.f32.mrf.mxu2 }
 0x171   : > { %v479_v36 = vmul.f32 0.25, %v476_v35 }
 0x173   : > { %726 = vmatmul.msk.f32.vlgmr.msra.gmra.mxu3 %vm484_vm2, %v479_v36 }
 0x1f6   : > { %v505_v40 = vpop.f32.mrf.mxu3 }
 0x1f7   : > { %v508_v41 = vsub.f32 %v438_v32, %v505_v40 }
 0x1f9   : > { %v509_v43 = vmul.f32 %v508_v41, %v508_v41 }
 0x1fb   : > { %v510_v44 = vadd.f32 %v509_v43, %v442_v42 }
 0x1fd   : > { %527 = vmatmul.f32.vlgmr.msrb.gmra.mxu3 %v510_v44 }
 0x280   : > { %v528_v45 = vpop.f32.mrf.mxu3 }
 0x281   : > { %v531_v46 = vmul.f32 0.25, %v528_v45 }
 0x283   : > { %v533_v47 = vadd.f32 1e-05, %v531_v46 }
 0x285   : > { %788 = vrsqrt.f32 %v533_v47  ;;  %vm540_vm4 = vweird.f32 %v533_v47 }
 0x28b   : > { %v789_v48 = vpop.eup %788 }
 0x28c   : > { %v535_v49 = vmul.f32 %v789_v48, %v533_v47  ;;  %vm541_vm3 = vweird.f32 %v789_v48 }
 0x28d   : > { %vm542_vm5 = vmor %vm540_vm4, %vm541_vm3 }
 0x28e   : > { %v536_v50 = vmul.f32 %v789_v48, %v535_v49 }
 0x290   : > { %v537_v51 = vmul.f32 0.5, %v536_v50 }
 0x292   : > { %v538_v52 = vsub.f32 1.5, %v537_v51 }
 0x294   : > { %v539_v53 = vmul.f32 %v789_v48, %v538_v52 }
 0x296   : > { %v543_v55 = vsel %vm542_vm5, %v789_v48, %v539_v53 }
 0x297   : > { %v544_v56 = vmul.f32 %v543_v55, %v532_v54 }
 0x299   : > { %727 = vmatmul.msk.f32.vlgmr.msrb.gmra.mxu0 %vm484_vm2, %v544_v56  ;;  %v546_v58 = vmul.f32 %v544_v56, %v479_v36 }
 0x29b   : > { %v547_v59 = vsub.f32 %v545_v57, %v546_v58 }
 0x29d   : > { %728 = vmatmul.msk.f32.vlgmr.msrb.gmra.mxu1 %vm484_vm2, %v547_v59 }
 0x316   : > { %v568_v60 = vpop.f32.mrf.mxu0 }
 0x317   : > { %571 = vst [vmem:[#allocation6] sm:$0x1] %v568_v60 }
 0x31a   : > { %v596_v61 = vpop.f32.mrf.mxu1 }
 0x31b   : > { %599 = vst [vmem:[#allocation6 + $0x1] sm:$0x1] %v596_v61 }
 0x31c PF: > { %p729_p8 = scmp.ne.s32.totalorder %s872_s21, 1 }
 0x31e   : > { %603 = sbr.rel (%p729_p8) target bundleno = 812 (0x32c), region = 64 }
 0x323   : > { %v606_v62 = vld [vmem:[#allocation2] sm:$0x3]  ;;  %v790_v63 = vld [vmem:[#allocation6] ss:$0 sm:$0xff]  ;;  %v791_v0 = vld [vmem:[#allocation6 + $0x1] ss:$0 sm:$0xff] }
 0x324   : > { %v609_v1 = vmul.f32 %v790_v63, %v606_v62 }
 0x326   : > { %v612_v2 = vadd.f32 %v791_v0, %v609_v1 }
 0x328   : > { %vm613_vm6 = vcmp.ge.f32.partialorder %v612_v2, 0.0  ;;  %v614_v3 = vmul.f32 0.01, %v612_v2 }
 0x32a   : > { %v615_v4 = vsel %vm613_vm6, %v612_v2, %v614_v3 }
 0x32b   : > { %616 = vst [vmem:[#allocation10] sm:$0x3] %v615_v4 }
 0x32c PF: > { %p752_p9 = scmp.eq.s32.totalorder %s717_s24, 1  ;;  %s633_s29 = sshll.u32 %s1120_s6, 4  ;;  %s634_s29 = int_to_ptr.hbm [resolvable:$true] %s633_s29 }
 0x32d   : > { %s887_s30 = smov [#allocation10]  }
 0x32e   : > { %s631_s21 = sshll.u32 %s887_s30, 4  ;;  %s632_s21 = int_to_ptr.vmem [resolvable:$true] %s631_s21 }
 0x32f   : > { %739 = dma.vmem_to_hbm [thread:$0]  (%p752_p9), %s632_s21, 32, %s634_s29, [#allocation9]  }
 0x330 PF: > { %p753_p10 = scmp.ge.s32.totalorder %s880_s23, 2  ;;  %p754_p11 = scmp.eq.s32.totalorder %s718_s25, 1 }
 0x332   : > { %p747_p12 = pnand %p754_p11, %p753_p10 }
 0x334   : > { %p748_p13 = pneg %p747_p12 }
 0x336   : > { %867 = dma.done.wait (%p748_p13), [#allocation9], 32  }
 0x337   : > { %869 = vsyncadd (%p748_p13), [#allocation9], 4294967264  ;;  %s20_s23 = sadd.s32 1, %s880_s23   ;;  %s1122_s21 = smov %s876_s22 }
 0x338   : > { %p17_p0 = scmp.ge.s32.totalorder %s20_s23, 4   ;;  %s1123_s22 = smov %s1125_s26 }
 0x33a   :  { %19 = sbr.rel (!%p17_p0) target bundleno = 4 (0x4), region = 102 }
 0x33f   :  { %652 = vsyncpa [#allocation8], 1 }
 0x340   :  { %654 = vsyncpa [#allocation8 + $0x1], 1 }
 0x341   :  { %655 = vsyncpa [#allocation9], 1 }
 0x342   :  { %657 = vsyncpa [#allocation9 + $0x1], 1 }

</bundles_post_ra>
